<compile_context>
chip_gen: v7x
topology: tpu7x:2x2x1
jax: 0.10.0
libtpu: 0.0.40
codegen_flags: <defaults>
</compile_context>

<pallas_src>
import functools

import jax
import jax.numpy as jnp
from jax.experimental import pallas as pl
from jax.experimental.pallas import tpu as pltpu

TB_MAX = 512           # batch tile cap (>= 2-4 grid steps for typical batches)
ROW_ALIGN = 16         # bf16 sublane tile -> keep row tiles multiples of 16
HPAD = 128             # lane-dense padded width for fc1/fc2/logits
NEG_MASK = -1e30       # mask value for pad logit lanes
VMEM_X_BUDGET = 8 * 1024 * 1024   # budget for double-buffered f32 x stream


def _round_up(a, m):
    return (a + m - 1) // m * m


def _sigmoid_eup(x):
    # sigmoid(x) == 0.5 * tanh(0.5 * x) + 0.5 ; tanh lowers to the EUP slot,
    # avoiding VALU Newton iterations from a generic divide (v5e has no
    # bf16 VPU and a tight VALU budget).
    return 0.5 * jnp.tanh(0.5 * x) + 0.5


def _mlp_kernel(x_ref, w0_ref, b0_ref, w1_ref, b1_ref, w2_ref, b2_ref, o_ref):
    """One batch tile, fully resident in VMEM.

    x_ref : (TB, D)     f32 flattened input tile (cast to bf16 in-VMEM)
    w0    : (D, 128)    bf16   b0 : (1, 128) f32
    w1    : (128, 128)  bf16   b1 : (1, 128) f32   (cols 64.. are zero pad)
    w2    : (128, 128)  bf16   b2 : (1, 128) f32   (rows 64.. / cols 10.. pad;
                                                    b2 pad lanes = -1e30 mask)
    o_ref : (TB, 128)   bf16 lane-dense log-probs (cols 10.. are garbage,
                        sliced off in the wrapper)
    """
    # In-kernel f32 -> bf16 cast (cheap VPU work, hidden under the x DMA).
    xb = x_ref[...].astype(jnp.bfloat16)

    # fc0 + sigmoid (bf16 MXU, f32 accumulate; activation math in f32)
    h0 = jnp.dot(xb, w0_ref[...],
                 preferred_element_type=jnp.float32) + b0_ref[...]
    h0 = _sigmoid_eup(h0)

    # fc1 + sigmoid (padded to 128 lanes; pad cols give sigmoid(0)=0.5, which
    # is annihilated by the zero pad rows of w2)
    h1 = jnp.dot(h0.astype(jnp.bfloat16), w1_ref[...],
                 preferred_element_type=jnp.float32) + b1_ref[...]
    h1 = _sigmoid_eup(h1)

    # fc2 logits, lane-dense (pad lanes pushed to -1e30 via b2)
    logits = jnp.dot(h1.astype(jnp.bfloat16), w2_ref[...],
                     preferred_element_type=jnp.float32) + b2_ref[...]

    # numerically stable log_softmax over the full 128 lanes; pad lanes
    # contribute exp(-huge) == 0 to the sum.  Math in f32, store bf16.
    m = jnp.max(logits, axis=-1, keepdims=True)
    shifted = logits - m
    lse = jnp.log(jnp.sum(jnp.exp(shifted), axis=-1, keepdims=True))
    o_ref[...] = (shifted - lse).astype(o_ref.dtype)


@functools.partial(jax.jit, static_argnames=("image_size",))
def third_network_forward(x, params, *, image_size):
    """x: (B, C, H, W) with C*H*W == image_size. Returns (B, 10) bf16 log-probs."""
    xb = x.reshape(-1, image_size)           # stays f32 -- no wrapper cast/pad
    B, D = xb.shape
    w0, b0, w1, b1, w2, b2 = params

    # --- wrapper-side layout plumbing (small weight arrays only) ---
    w0b = w0.astype(jnp.bfloat16)                                         # (D, 128)
    b0f = b0.astype(jnp.float32)                                          # (1, 128)
    w1b = jnp.pad(w1, ((0, 0), (0, HPAD - 64))).astype(jnp.bfloat16)      # (128,128)
    b1f = jnp.pad(b1, ((0, 0), (0, HPAD - 64))).astype(jnp.float32)       # (1,128)
    w2b = jnp.pad(w2, ((0, HPAD - 64), (0, HPAD - 10))).astype(jnp.bfloat16)  # (128,128)
    b2f = jnp.pad(b2.astype(jnp.float32), ((0, 0), (0, HPAD - 10)),
                  constant_values=NEG_MASK)                               # (1, 128)

    # --- batch tiling: aim for >= 4 grid steps (v7x megacore), cap the tile,
    #     and keep the double-buffered f32 x stream within the VMEM budget ---
    tb = min(TB_MAX, max(ROW_ALIGN, _round_up(pl.cdiv(B, 4), ROW_ALIGN)))
    tb_vmem = max(ROW_ALIGN,
                  (VMEM_X_BUDGET // (2 * 4 * D)) // ROW_ALIGN * ROW_ALIGN)
    tb = min(tb, tb_vmem)
    grid = (pl.cdiv(B, tb),)                 # ragged last block handled by Pallas

    bytes_accessed = (
        B * D * 4                                     # f32 input stream
        + (w0b.size + w1b.size + w2b.size) * 2        # bf16 weights (resident)
        + (b0f.size + b1f.size + b2f.size) * 4        # f32 biases
        + B * HPAD * 2                                # bf16 lane-dense output
    )
    cost = pl.CostEstimate(
        flops=2 * B * (D * 128 + 128 * HPAD + HPAD * HPAD),
        transcendentals=B * (HPAD * 3),               # tanh x2 + softmax exp
        bytes_accessed=bytes_accessed,
    )

    out = pl.pallas_call(
        _mlp_kernel,
        out_shape=jax.ShapeDtypeStruct((B, HPAD), jnp.bfloat16),
        grid_spec=pl.GridSpec(
            grid=grid,
            in_specs=[
                pl.BlockSpec((tb, D), lambda i: (i, 0)),       # x: streamed f32
                pl.BlockSpec((D, 128), lambda i: (0, 0)),      # w0: resident
                pl.BlockSpec((1, 128), lambda i: (0, 0)),      # b0
                pl.BlockSpec((HPAD, HPAD), lambda i: (0, 0)),  # w1
                pl.BlockSpec((1, HPAD), lambda i: (0, 0)),     # b1
                pl.BlockSpec((HPAD, HPAD), lambda i: (0, 0)),  # w2
                pl.BlockSpec((1, HPAD), lambda i: (0, 0)),     # b2
            ],
            out_specs=pl.BlockSpec((tb, HPAD), lambda i: (i, 0)),
        ),
        compiler_params=pltpu.CompilerParams(
            dimension_semantics=("parallel",),
            vmem_limit_bytes=32 * 1024 * 1024,
        ),
        cost_estimate=cost,
    )(xb, w0b, b0f, w1b, b1f, w2b, b2f)

    # Cheap bf16 lane slice (40 B/row read after the kernel, vs 512 B/row
    # previously); kept inside jit so XLA can fuse it into consumers.
    return out[:, :10]


def init_params(key, image_size):
    """Deterministic init mirroring torch.nn.Linear default:
    U(-1/sqrt(fan_in), 1/sqrt(fan_in)) for weight and bias.
    Weights stored as (in_features, out_features)."""
    dims = [(image_size, 128), (128, 64), (64, 10), (10, 10), (10, 10), (10, 10)]
    params = []
    for (fan_in, fan_out) in dims:
        key, kw, kb = jax.random.split(key, 3)
        bound = 1.0 / jnp.sqrt(jnp.float32(fan_in))
        w = jax.random.uniform(kw, (fan_in, fan_out), jnp.float32, -bound, bound)
        b = jax.random.uniform(kb, (1, fan_out), jnp.float32, -bound, bound)
        params.append((w, b))
    # Only fc0, fc1, fc2 are used in forward; fc3/fc4/fc5 exist for parity.
    (w0, b0), (w1, b1), (w2, b2), _fc3, _fc4, _fc5 = params
    return (w0, b0, w1, b1, w2, b2)


if __name__ == "__main__":
    key = jax.random.PRNGKey(0)
    k_x, k_p = jax.random.split(key)

    # Small input: batch=2, channels=4, spatial=16x16 -> image_size = 1024
    B, C, H, W = 2, 4, 16, 16
    image_size = C * H * W
    x = jax.random.normal(k_x, (B, C, H, W), jnp.float32)

    params = init_params(k_p, image_size)

    out = third_network_forward(x, params, image_size=image_size)
    out = jax.block_until_ready(out)

    # sanity: log_softmax rows sum (in prob space) to ~1 (bf16 output tolerance)
    assert out.shape == (B, 10)
    out_f32 = out.astype(jnp.float32)
    row_sums = jnp.sum(jnp.exp(out_f32), axis=1)
    assert jnp.allclose(row_sums, jnp.ones_like(row_sums), atol=2e-2)
    assert bool(jnp.all(jnp.isfinite(out_f32)))

    print("KERNEL_OK")
</pallas_src>

<mosaic_0001>
module attributes {stable_mosaic.version = 11 : i64} {
  func.func @_mlp_kernel(%arg0: i32, %arg1: memref<16x1024xf32, #tpu.memory_space<vmem>>, %arg2: memref<1024x128xbf16, #tpu.memory_space<vmem>>, %arg3: memref<1x128xf32, #tpu.memory_space<vmem>>, %arg4: memref<128x128xbf16, #tpu.memory_space<vmem>>, %arg5: memref<1x128xf32, #tpu.memory_space<vmem>>, %arg6: memref<128x128xbf16, #tpu.memory_space<vmem>>, %arg7: memref<1x128xf32, #tpu.memory_space<vmem>>, %arg8: memref<16x128xbf16, #tpu.memory_space<vmem>>) attributes {dimension_semantics = [#tpu.dimension_semantics<parallel>], iteration_bounds = array<i64: 1>, scalar_prefetch = 0 : i64, scratch_operands = 0 : i64, tpu.core_type = #tpu.core_type<tc>, window_params = [{transform_indices = @transform_0, window_bounds = array<i64: 16, 1024>}, {pipeline_mode = #tpu.pipeline_mode<synchronous>, transform_indices = @transform_1, window_bounds = array<i64: 1024, 128>}, {pipeline_mode = #tpu.pipeline_mode<synchronous>, transform_indices = @transform_2, window_bounds = array<i64: 1, 128>}, {pipeline_mode = #tpu.pipeline_mode<synchronous>, transform_indices = @transform_3, window_bounds = array<i64: 128, 128>}, {pipeline_mode = #tpu.pipeline_mode<synchronous>, transform_indices = @transform_4, window_bounds = array<i64: 1, 128>}, {pipeline_mode = #tpu.pipeline_mode<synchronous>, transform_indices = @transform_5, window_bounds = array<i64: 128, 128>}, {pipeline_mode = #tpu.pipeline_mode<synchronous>, transform_indices = @transform_6, window_bounds = array<i64: 1, 128>}, {transform_indices = @transform_7, window_bounds = array<i64: 16, 128>}]} {
    %c0 = arith.constant 0 : index
    %c0_0 = arith.constant 0 : index
    %0 = vector.load %arg1[%c0, %c0_0] : memref<16x1024xf32, #tpu.memory_space<vmem>>, vector<16x1024xf32>
    %1 = arith.truncf %0 : vector<16x1024xf32> to vector<16x1024xbf16>
    %c0_1 = arith.constant 0 : index
    %c0_2 = arith.constant 0 : index
    %2 = vector.load %arg2[%c0_1, %c0_2] : memref<1024x128xbf16, #tpu.memory_space<vmem>>, vector<1024x128xbf16>
    %cst = arith.constant dense<0.000000e+00> : vector<16x128xf32>
    %3 = tpu.matmul %1, %2, %cst {dimension_numbers = #tpu.dot_dimension_numbers<[1], [0], [0], [1], [0, 0, 1, 1], [], []>} : vector<16x1024xbf16>, vector<1024x128xbf16>, vector<16x128xf32> -> vector<16x128xf32>
    %c0_3 = arith.constant 0 : index
    %c0_4 = arith.constant 0 : index
    %4 = vector.load %arg3[%c0_3, %c0_4] : memref<1x128xf32, #tpu.memory_space<vmem>>, vector<1x128xf32>
    %5 = vector.broadcast %4 : vector<1x128xf32> to vector<16x128xf32>
    %6 = arith.addf %3, %5 : vector<16x128xf32>
    %cst_5 = arith.constant 5.000000e-01 : f32
    %7 = vector.broadcast %cst_5 : f32 to vector<16x128xf32>
    %8 = arith.mulf %7, %6 : vector<16x128xf32>
    %9 = math.tanh %8 : vector<16x128xf32>
    %cst_6 = arith.constant 5.000000e-01 : f32
    %10 = vector.broadcast %cst_6 : f32 to vector<16x128xf32>
    %11 = arith.mulf %10, %9 : vector<16x128xf32>
    %cst_7 = arith.constant 5.000000e-01 : f32
    %12 = vector.broadcast %cst_7 : f32 to vector<16x128xf32>
    %13 = arith.addf %11, %12 : vector<16x128xf32>
    %14 = arith.truncf %13 : vector<16x128xf32> to vector<16x128xbf16>
    %c0_8 = arith.constant 0 : index
    %c0_9 = arith.constant 0 : index
    %15 = vector.load %arg4[%c0_8, %c0_9] : memref<128x128xbf16, #tpu.memory_space<vmem>>, vector<128x128xbf16>
    %cst_10 = arith.constant dense<0.000000e+00> : vector<16x128xf32>
    %16 = tpu.matmul %14, %15, %cst_10 {dimension_numbers = #tpu.dot_dimension_numbers<[1], [0], [0], [1], [0, 0, 1, 1], [], []>} : vector<16x128xbf16>, vector<128x128xbf16>, vector<16x128xf32> -> vector<16x128xf32>
    %c0_11 = arith.constant 0 : index
    %c0_12 = arith.constant 0 : index
    %17 = vector.load %arg5[%c0_11, %c0_12] : memref<1x128xf32, #tpu.memory_space<vmem>>, vector<1x128xf32>
    %18 = vector.broadcast %17 : vector<1x128xf32> to vector<16x128xf32>
    %19 = arith.addf %16, %18 : vector<16x128xf32>
    %cst_13 = arith.constant 5.000000e-01 : f32
    %20 = vector.broadcast %cst_13 : f32 to vector<16x128xf32>
    %21 = arith.mulf %20, %19 : vector<16x128xf32>
    %22 = math.tanh %21 : vector<16x128xf32>
    %cst_14 = arith.constant 5.000000e-01 : f32
    %23 = vector.broadcast %cst_14 : f32 to vector<16x128xf32>
    %24 = arith.mulf %23, %22 : vector<16x128xf32>
    %cst_15 = arith.constant 5.000000e-01 : f32
    %25 = vector.broadcast %cst_15 : f32 to vector<16x128xf32>
    %26 = arith.addf %24, %25 : vector<16x128xf32>
    %27 = arith.truncf %26 : vector<16x128xf32> to vector<16x128xbf16>
    %c0_16 = arith.constant 0 : index
    %c0_17 = arith.constant 0 : index
    %28 = vector.load %arg6[%c0_16, %c0_17] : memref<128x128xbf16, #tpu.memory_space<vmem>>, vector<128x128xbf16>
    %cst_18 = arith.constant dense<0.000000e+00> : vector<16x128xf32>
    %29 = tpu.matmul %27, %28, %cst_18 {dimension_numbers = #tpu.dot_dimension_numbers<[1], [0], [0], [1], [0, 0, 1, 1], [], []>} : vector<16x128xbf16>, vector<128x128xbf16>, vector<16x128xf32> -> vector<16x128xf32>
    %c0_19 = arith.constant 0 : index
    %c0_20 = arith.constant 0 : index
    %30 = vector.load %arg7[%c0_19, %c0_20] : memref<1x128xf32, #tpu.memory_space<vmem>>, vector<1x128xf32>
    %31 = vector.broadcast %30 : vector<1x128xf32> to vector<16x128xf32>
    %32 = arith.addf %29, %31 : vector<16x128xf32>
    %cst_21 = arith.constant dense<0xFF800000> : vector<16xf32>
    %33 = vector.multi_reduction <maximumf>, %32, %cst_21 [1] : vector<16x128xf32> to vector<16xf32>
    %34 = vector.shape_cast %33 : vector<16xf32> to vector<16x1xf32>
    %35 = vector.broadcast %34 : vector<16x1xf32> to vector<16x128xf32>
    %36 = arith.subf %32, %35 : vector<16x128xf32>
    %37 = math.exp %36 : vector<16x128xf32>
    %cst_22 = arith.constant dense<0.000000e+00> : vector<16xf32>
    %38 = vector.multi_reduction <add>, %37, %cst_22 [1] : vector<16x128xf32> to vector<16xf32>
    %39 = vector.shape_cast %38 : vector<16xf32> to vector<16x1xf32>
    %40 = math.log %39 : vector<16x1xf32>
    %41 = vector.broadcast %40 : vector<16x1xf32> to vector<16x128xf32>
    %42 = arith.subf %36, %41 : vector<16x128xf32>
    %43 = arith.truncf %42 : vector<16x128xf32> to vector<16x128xbf16>
    %c0_23 = arith.constant 0 : index
    %c0_24 = arith.constant 0 : index
    %44 = vector.load %arg8[%c0_23, %c0_24] : memref<16x128xbf16, #tpu.memory_space<vmem>>, vector<16x128xbf16>
    tpu.vector_store %arg8[%c0_23, %c0_24], %43 {strides = array<i32>} : memref<16x128xbf16, #tpu.memory_space<vmem>>, vector<16x128xbf16>,
    return
  }
  func.func @transform_0(%arg0: i32) -> (i32, i32) {
    %c0_i32 = arith.constant 0 : i32
    %c0_i32_0 = arith.constant 0 : i32
    return %arg0, %c0_i32 : i32, i32
  }
  func.func @transform_1(%arg0: i32) -> (i32, i32) {
    %c0_i32 = arith.constant 0 : i32
    %c0_i32_0 = arith.constant 0 : i32
    %c0_i32_1 = arith.constant 0 : i32
    return %c0_i32, %c0_i32_0 : i32, i32
  }
  func.func @transform_2(%arg0: i32) -> (i32, i32) {
    %c0_i32 = arith.constant 0 : i32
    %c0_i32_0 = arith.constant 0 : i32
    %c0_i32_1 = arith.constant 0 : i32
    return %c0_i32, %c0_i32_0 : i32, i32
  }
  func.func @transform_3(%arg0: i32) -> (i32, i32) {
    %c0_i32 = arith.constant 0 : i32
    %c0_i32_0 = arith.constant 0 : i32
    %c0_i32_1 = arith.constant 0 : i32
    return %c0_i32, %c0_i32_0 : i32, i32
  }
  func.func @transform_4(%arg0: i32) -> (i32, i32) {
    %c0_i32 = arith.constant 0 : i32
    %c0_i32_0 = arith.constant 0 : i32
    %c0_i32_1 = arith.constant 0 : i32
    return %c0_i32, %c0_i32_0 : i32, i32
  }
  func.func @transform_5(%arg0: i32) -> (i32, i32) {
    %c0_i32 = arith.constant 0 : i32
    %c0_i32_0 = arith.constant 0 : i32
    %c0_i32_1 = arith.constant 0 : i32
    return %c0_i32, %c0_i32_0 : i32, i32
  }
  func.func @transform_6(%arg0: i32) -> (i32, i32) {
    %c0_i32 = arith.constant 0 : i32
    %c0_i32_0 = arith.constant 0 : i32
    %c0_i32_1 = arith.constant 0 : i32
    return %c0_i32, %c0_i32_0 : i32, i32
  }
  func.func @transform_7(%arg0: i32) -> (i32, i32) {
    %c0_i32 = arith.constant 0 : i32
    %c0_i32_0 = arith.constant 0 : i32
    return %arg0, %c0_i32 : i32, i32
  }
}

</mosaic_0001>

<bundles_post_ra>
// kernel: third_network_forward.1
= control target key start
LH: loop header
LB: loop body
LE: loop exit
PB: predicated region body
PF: predicated region fallthrough
CT: control target
= control target key end

     0   :  { %12 = vsyncpa [#allocation3], 0  ;;  %v67_v29 = vlaneseq  ;;  %v1641_v33 = vmov 1983009808   ;;  %vm1643_vm0 = vmmov 0   ;;  %s2037_s0 = inlined_call_operand.vmem [shape: f32[2,1024], index: 0, kind: input, shape index: {}]   ;;  %s2038_s1 = inlined_call_operand.vmem [shape: bf16[1024,128], index: 1, kind: input, shape index: {}]   ;;  %s2039_s2 = inlined_call_operand.vmem [shape: f32[1,128], index: 2, kind: input, shape index: {}]   ;;  %s2040_s3 = inlined_call_operand.vmem [shape: bf16[128,128], index: 3, kind: input, shape index: {}]   ;;  %s2041_s4 = inlined_call_operand.vmem [shape: f32[1,128], index: 4, kind: input, shape index: {}]   ;;  %s2042_s5 = inlined_call_operand.vmem [shape: bf16[128,128], index: 5, kind: input, shape index: {}]   ;;  %s2043_s6 = inlined_call_operand.vmem [shape: f32[1,128], index: 6, kind: input, shape index: {}]   ;;  %s2044_s7 = inlined_call_operand.hbm [shape: bf16[2,128], index: 7, kind: output, shape index: {}]  }
   0x1   :  { %v1497_v0 = vld [vmem:[%s2038_s1 + $0x40] sm:$0xff]   ;;  %v1501_v4 = vld [vmem:[%s2038_s1 + $0x48] sm:$0xff]   ;;  %v1505_v8 = vld [vmem:[%s2038_s1 + $0x50] sm:$0xff]   ;;  %v65_v34 = vunpack.c.l.s4 %v1641_v33 }
   0x2   :  { %v1498_v1 = vld [vmem:[%s2038_s1 + $0xc0] sm:$0xff]   ;;  %1344 = vmatprep.subr.bf16.mxu0 %v1497_v0  ;;  %v1502_v5 = vld [vmem:[%s2038_s1 + $0xc8] sm:$0xff]   ;;  %v1506_v9 = vld [vmem:[%s2038_s1 + $0xd0] sm:$0xff]   ;;  %v1784_v35 = vshrl.u32 %v67_v29, 7 }
   0x3   :  { %v1499_v2 = vld [vmem:[%s2038_s1] sm:$0xff]   ;;  %1366 = vmatprep.subr.bf16.mxu1 %v1498_v1  ;;  %v1503_v6 = vld [vmem:[%s2038_s1 + $0x8] sm:$0xff]   ;;  %v1507_v10 = vld [vmem:[%s2038_s1 + $0x10] sm:$0xff]   ;;  %v66_v38 = vunpack.c.0.s8 %v65_v34 }
   0x4   :  { %v1500_v3 = vld [vmem:[%s2038_s1 + $0x80] sm:$0xff]   ;;  %1345 = vmatpush3.bf16.msra.mxu0 %v1499_v2  ;;  %v1504_v7 = vld [vmem:[%s2038_s1 + $0x88] sm:$0xff]   ;;  %v1508_v11 = vld [vmem:[%s2038_s1 + $0x90] sm:$0xff]  }
   0x5   :  { %1367 = vmatpush3.bf16.msra.mxu1 %v1500_v3  ;;  %1346 = vmatprep.subr.bf16.mxu0 %v1501_v4  ;;  %v1509_v12 = vld [vmem:[%s2038_s1 + $0x58] sm:$0xff]   ;;  %v1513_v16 = vld [vmem:[%s2038_s1 + $0x60] sm:$0xff]   ;;  %v1517_v20 = vld [vmem:[%s2038_s1 + $0x68] sm:$0xff]   ;;  %v1805_v43 = vsub.s32 %v66_v38, %v1784_v35 }
   0x6   :  { %1368 = vmatprep.subr.bf16.mxu1 %v1502_v5  ;;  %v1510_v13 = vld [vmem:[%s2038_s1 + $0xd8] sm:$0xff]   ;;  %v1514_v17 = vld [vmem:[%s2038_s1 + $0xe0] sm:$0xff]   ;;  %v1518_v21 = vld [vmem:[%s2038_s1 + $0xe8] sm:$0xff]  }
   0x7   :  { %v1511_v14 = vld [vmem:[%s2038_s1 + $0x18] sm:$0xff]   ;;  %v1515_v18 = vld [vmem:[%s2038_s1 + $0x20] sm:$0xff]   ;;  %v1519_v22 = vld [vmem:[%s2038_s1 + $0x28] sm:$0xff]  }
   0x8   :  { %1347 = vmatpush3.bf16.msra.mxu0 %v1503_v6  ;;  %v1512_v15 = vld [vmem:[%s2038_s1 + $0x98] sm:$0xff]   ;;  %v1516_v19 = vld [vmem:[%s2038_s1 + $0xa0] sm:$0xff]   ;;  %v1520_v23 = vld [vmem:[%s2038_s1 + $0xa8] sm:$0xff]  }
   0x9   :  { %1369 = vmatpush3.bf16.msra.mxu1 %v1504_v7  ;;  %1348 = vmatprep.subr.bf16.mxu0 %v1505_v8  ;;  %v1521_v24 = vld [vmem:[%s2038_s1 + $0x70] sm:$0xff]   ;;  %v1525_v28 = vld [vmem:[%s2038_s1 + $0x78] sm:$0xff]   ;;  %v1541_v46 = vld [vmem:[%s2038_s1 + $0x140] sm:$0xff]  }
   0xa   :  { %1370 = vmatprep.subr.bf16.mxu1 %v1506_v9  ;;  %v1522_v25 = vld [vmem:[%s2038_s1 + $0xf0] sm:$0xff]   ;;  %v1526_v30 = vld [vmem:[%s2038_s1 + $0xf8] sm:$0xff]   ;;  %v1542_v51 = vld [vmem:[%s2038_s1 + $0x1c0] sm:$0xff]  }
   0xb   :  { %v1523_v26 = vld [vmem:[%s2038_s1 + $0x30] sm:$0xff]   ;;  %v1527_v31 = vld [vmem:[%s2038_s1 + $0x38] sm:$0xff]   ;;  %v1543_v60 = vld [vmem:[%s2038_s1 + $0x100] sm:$0xff]  }
   0xc   :  { %1349 = vmatpush3.bf16.msra.mxu0 %v1507_v10  ;;  %v1524_v27 = vld [vmem:[%s2038_s1 + $0xb0] sm:$0xff]   ;;  %v1528_v32 = vld [vmem:[%s2038_s1 + $0xb8] sm:$0xff]   ;;  %v1544_v1 = vld [vmem:[%s2038_s1 + $0x180] sm:$0xff]  }
   0xd   :  { %1371 = vmatpush3.bf16.msra.mxu1 %v1508_v11  ;;  %1350 = vmatprep.subr.bf16.mxu0 %v1509_v12  ;;  %v1529_v36 = vld [vmem:[%s2037_s0] ss:$16 sps:$4 sm:$0xff]   ;;  %v1537_v41 = vld [vmem:[%s2037_s0 + $0x4] ss:$16 sps:$4 sm:$0xff]   ;;  %v1545_v4 = vld [vmem:[%s2038_s1 + $0x148] sm:$0xff]  }
   0xe   :  { %1372 = vmatprep.subr.bf16.mxu1 %v1510_v13  ;;  %v1531_v37 = vld [vmem:[%s2037_s0 + $0x20] ss:$16 sps:$4 sm:$0xff]   ;;  %v1538_v42 = vld [vmem:[%s2037_s0 + $0x24] ss:$16 sps:$4 sm:$0xff]   ;;  %v70_v47 = vrot.slane %v1529_v36, %v1805_v43  ;;  %v77_v52 = vrot.slane %v1537_v41, %v1805_v43  ;;  %v1546_v7 = vld [vmem:[%s2038_s1 + $0x1c8] sm:$0xff]  }
   0xf   :  { %v1533_v39 = vld [vmem:[%s2037_s0 + $0x40] ss:$16 sps:$4 sm:$0xff]   ;;  %v1539_v44 = vld [vmem:[%s2037_s0 + $0x44] ss:$16 sps:$4 sm:$0xff]   ;;  %v84_v48 = vrot.slane %v1531_v37, %v1805_v43  ;;  %v91_v53 = vrot.slane %v1538_v42, %v1805_v43  ;;  %v1547_v8 = vld [vmem:[%s2038_s1 + $0x108] sm:$0xff]  }
  0x10   :  { %1351 = vmatpush3.bf16.msra.mxu0 %v1511_v14  ;;  %v1535_v40 = vld [vmem:[%s2037_s0 + $0x60] ss:$16 sps:$4 sm:$0xff]   ;;  %v1540_v45 = vld [vmem:[%s2037_s0 + $0x64] ss:$16 sps:$4 sm:$0xff]   ;;  %v142_v49 = vrot.slane %v1533_v39, %v1805_v43  ;;  %v149_v54 = vrot.slane %v1539_v44, %v1805_v43  ;;  %v1548_v9 = vld [vmem:[%s2038_s1 + $0x188] sm:$0xff]  }
  0x11   :  { %1373 = vmatpush3.bf16.msra.mxu1 %v1512_v15  ;;  %1352 = vmatprep.subr.bf16.mxu0 %v1513_v16  ;;  %v156_v50 = vrot.slane %v1535_v40, %v1805_v43  ;;  %v163_v55 = vrot.slane %v1540_v45, %v1805_v43  ;;  %v93_v56 = vcombine.high %v70_v47, %v84_v48  ;;  %v1549_v10 = vld [vmem:[%s2038_s1 + $0x150] sm:$0xff]   ;;  %v1553_v14 = vld [vmem:[%s2038_s1 + $0x158] sm:$0xff]  }
  0x12   :  { %1374 = vmatprep.subr.bf16.mxu1 %v1514_v17  ;;  %v92_v58 = vcombine.low %v70_v47, %v84_v48  ;;  %v95_v61 = vcombine.high %v77_v52, %v91_v53  ;;  %v94_v63 = vcombine.low %v77_v52, %v91_v53  ;;  %v1550_v11 = vld [vmem:[%s2038_s1 + $0x1d0] sm:$0xff]   ;;  %v1554_v15 = vld [vmem:[%s2038_s1 + $0x1d8] sm:$0xff]  }
  0x13   :  { %v165_v57 = vcombine.high %v142_v49, %v156_v50  ;;  %v164_v59 = vcombine.low %v142_v49, %v156_v50  ;;  %v167_v62 = vcombine.high %v149_v54, %v163_v55  ;;  %v166_v0 = vcombine.low %v149_v54, %v163_v55  ;;  %v1551_v12 = vld [vmem:[%s2038_s1 + $0x110] sm:$0xff]   ;;  %v1555_v16 = vld [vmem:[%s2038_s1 + $0x118] sm:$0xff]  }
  0x14   :  { %1353 = vmatpush3.bf16.msra.mxu0 %v1515_v18  ;;  %v1552_v13 = vld [vmem:[%s2038_s1 + $0x190] sm:$0xff]   ;;  %v1556_v17 = vld [vmem:[%s2038_s1 + $0x198] sm:$0xff]   ;;  %v1557_v18 = vld [vmem:[%s2038_s1 + $0x160] sm:$0xff]  }
  0x15   :  { %1375 = vmatpush3.bf16.msra.mxu1 %v1516_v19  ;;  %1354 = vmatprep.subr.bf16.mxu0 %v1517_v20  ;;  %v221_v2 = vpack.c.bf16 %v165_v57, %v93_v56  ;;  %v220_v3 = vpack.c.bf16 %v164_v59, %v92_v58  ;;  %v223_v5 = vpack.c.bf16 %v167_v62, %v95_v61  ;;  %v1558_v19 = vld [vmem:[%s2038_s1 + $0x1e0] sm:$0xff]   ;;  %v1568_v29 = vld [vmem:[%s2038_s1 + $0x1b0] sm:$0xff]   ;;  %v1572_v33 = vld [vmem:[%s2038_s1 + $0x1b8] sm:$0xff]  }
  0x16   :  { %1376 = vmatprep.subr.bf16.mxu1 %v1518_v21  ;;  %v222_v6 = vpack.c.bf16 %v166_v0, %v94_v63  ;;  %v1559_v20 = vld [vmem:[%s2038_s1 + $0x120] sm:$0xff]   ;;  %v1573_v34 = vld [vmem:[%s2037_s0 + $0x8] ss:$16 sps:$4 sm:$0xff]   ;;  %v1581_v39 = vld [vmem:[%s2037_s0 + $0xc] ss:$16 sps:$4 sm:$0xff]  }
  0x17   :  { %779 = vmatprep.mubr.bf16.mxu0 %v221_v2  ;;  %820 = vmatprep.mubr.bf16.mxu1 %v223_v5  ;;  %v1560_v21 = vld [vmem:[%s2038_s1 + $0x1a0] sm:$0xff]   ;;  %v1575_v36 = vld [vmem:[%s2037_s0 + $0x28] ss:$16 sps:$4 sm:$0xff]   ;;  %v106_v40 = vrot.slane %v1573_v34, %v1805_v43  ;;  %v1582_v42 = vld [vmem:[%s2037_s0 + $0x2c] ss:$16 sps:$4 sm:$0xff]   ;;  %v113_v48 = vrot.slane %v1581_v39, %v1805_v43 }
  0x18   :  { %1355 = vmatpush3.bf16.msra.mxu0 %v1519_v22  ;;  %v1561_v22 = vld [vmem:[%s2038_s1 + $0x168] sm:$0xff]   ;;  %v120_v41 = vrot.slane %v1575_v36, %v1805_v43  ;;  %v127_v50 = vrot.slane %v1582_v42, %v1805_v43  ;;  %v1585_v0 = vld [vmem:[%s2040_s3] sm:$0xff]   ;;  %v1587_v2 = vld [vmem:[%s2040_s3 + $0x10] sm:$0xff]  }
  0x19   :  { %1377 = vmatpush3.bf16.msra.mxu1 %v1520_v23  ;;  %1356 = vmatprep.subr.bf16.mxu0 %v1521_v24  ;;  %v1562_v23 = vld [vmem:[%s2038_s1 + $0x1e8] sm:$0xff]  }
  0x1a   :  { %1378 = vmatprep.subr.bf16.mxu1 %v1522_v25  ;;  %v1563_v24 = vld [vmem:[%s2038_s1 + $0x128] sm:$0xff]   ;;  %v129_v49 = vcombine.high %v106_v40, %v120_v41  ;;  %v128_v54 = vcombine.low %v106_v40, %v120_v41  ;;  %v131_v56 = vcombine.high %v113_v48, %v127_v50  ;;  %v130_v58 = vcombine.low %v113_v48, %v127_v50 }
  0x1b   :  { %v1564_v25 = vld [vmem:[%s2038_s1 + $0x1a8] sm:$0xff]  }
  0x1c   :  { %1357 = vmatpush3.bf16.msra.mxu0 %v1523_v26  ;;  %v1565_v26 = vld [vmem:[%s2038_s1 + $0x170] sm:$0xff]   ;;  %v1577_v37 = vld [vmem:[%s2037_s0 + $0x48] ss:$16 sps:$4 sm:$0xff]   ;;  %v1583_v44 = vld [vmem:[%s2037_s0 + $0x4c] ss:$16 sps:$4 sm:$0xff]  }
  0x1d   :  { %1379 = vmatpush3.bf16.msra.mxu1 %v1524_v27  ;;  %1358 = vmatprep.subr.bf16.mxu0 %v1525_v28  ;;  %v1566_v27 = vld [vmem:[%s2038_s1 + $0x1f0] sm:$0xff]   ;;  %v1579_v38 = vld [vmem:[%s2037_s0 + $0x68] ss:$16 sps:$4 sm:$0xff]   ;;  %v1584_v45 = vld [vmem:[%s2037_s0 + $0x6c] ss:$16 sps:$4 sm:$0xff]  }
  0x1e   :  { %1380 = vmatprep.subr.bf16.mxu1 %v1526_v30  ;;  %v1567_v28 = vld [vmem:[%s2038_s1 + $0x130] sm:$0xff]   ;;  %v1569_v30 = vld [vmem:[%s2038_s1 + $0x178] sm:$0xff]   ;;  %v192_v47 = vrot.slane %v1579_v38, %v1805_v43  ;;  %v199_v52 = vrot.slane %v1584_v45, %v1805_v43  ;;  %v1590_v5 = vld [vmem:[%s2040_s3 + $0x28] sm:$0xff]  }
  0x20   :  { %1359 = vmatpush3.bf16.msra.mxu0 %v1527_v31  ;;  %v1570_v31 = vld [vmem:[%s2038_s1 + $0x1f8] sm:$0xff]  }
  0x21   :  { %1381 = vmatpush3.bf16.msra.mxu1 %v1528_v32  ;;  %1388 = vmatprep.subr.bf16.mxu0 %v1541_v46  ;;  %v1571_v32 = vld [vmem:[%s2038_s1 + $0x138] sm:$0xff]   ;;  %v178_v46 = vrot.slane %v1577_v37, %v1805_v43 }
  0x22   :  { %1410 = vmatprep.subr.bf16.mxu1 %v1542_v51  ;;  %v185_v51 = vrot.slane %v1583_v44, %v1805_v43  ;;  %v1642_v43 = vmov 0.0  }
  0x23   :  { %780 = vmatmul.mubr.bf16.vlgmr.msra.gmra.mrb[0].mxu0 %v220_v3  ;;  %v201_v53 = vcombine.high %v178_v46, %v192_v47  ;;  %v200_v55 = vcombine.low %v178_v46, %v192_v47  ;;  %v1588_v3 = vld [vmem:[%s2040_s3 + $0x18] sm:$0xff]  }
  0x24   :  { %821 = vmatmul.mubr.bf16.vlgmr.msra.gmra.mrb[0].mxu1 %v222_v6  ;;  %1389 = vmatpush3.bf16.msra.mxu0 %v1543_v60  ;;  %v203_v57 = vcombine.high %v185_v51, %v199_v52  ;;  %v202_v59 = vcombine.low %v185_v51, %v199_v52  ;;  %v1591_v6 = vld [vmem:[%s2040_s3 + $0x30] sm:$0xff]  }
  0x25   :  { %1411 = vmatpush3.bf16.msra.mxu1 %v1544_v1  ;;  %1390 = vmatprep.subr.bf16.mxu0 %v1545_v4  ;;  %v225_v60 = vpack.c.bf16 %v201_v53, %v129_v49  ;;  %v224_v61 = vpack.c.bf16 %v200_v55, %v128_v54  ;;  %v1586_v1 = vld [vmem:[%s2040_s3 + $0x8] sm:$0xff]   ;;  %v1589_v4 = vld [vmem:[%s2040_s3 + $0x20] sm:$0xff]   ;;  %v1595_v54 = vld [vmem:[%s2042_s5 + $0x10] sm:$0xff]  }
  0x26   :  { %1412 = vmatprep.subr.bf16.mxu1 %v1546_v7  ;;  %v227_v62 = vpack.c.bf16 %v203_v57, %v131_v56  ;;  %v226_v63 = vpack.c.bf16 %v202_v59, %v130_v58  ;;  %v1592_v7 = vld [vmem:[%s2040_s3 + $0x38] sm:$0xff]   ;;  %v1597_v56 = vld [vmem:[%s2042_s5 + $0x20] sm:$0xff]   ;;  %v1598_v57 = vld [vmem:[%s2042_s5 + $0x28] sm:$0xff]  }
  0x27   :  { %861 = vmatprep.mubr.bf16.mxu0 %v225_v60  ;;  %v1596_v55 = vld [vmem:[%s2042_s5 + $0x18] sm:$0xff]   ;;  %v1599_v58 = vld [vmem:[%s2042_s5 + $0x30] sm:$0xff]   ;;  %v1321_v60 = vld [vmem:[%s2041_s4] ss:$0 sm:$0xff] }
  0x28   :  { %1391 = vmatpush3.bf16.msra.mxu0 %v1547_v8  ;;  %902 = vmatprep.mubr.bf16.mxu1 %v227_v62  ;;  %v1593_v8 = vld [vmem:[%s2042_s5] sm:$0xff]   ;;  %v1600_v59 = vld [vmem:[%s2042_s5 + $0x38] sm:$0xff]  }
  0x29   :  { %1413 = vmatpush3.bf16.msra.mxu1 %v1548_v9  ;;  %1392 = vmatprep.subr.bf16.mxu0 %v1549_v10  ;;  %v1594_v9 = vld [vmem:[%s2042_s5 + $0x8] sm:$0xff]  }
  0x2a   :  { %1414 = vmatprep.subr.bf16.mxu1 %v1550_v11 }
  0x2c   :  { %1393 = vmatpush3.bf16.msra.mxu0 %v1551_v12  ;;  %v1256_v12 = vld [vmem:[%s2039_s2] ss:$0 sm:$0xff] }
  0x2d   :  { %1415 = vmatpush3.bf16.msra.mxu1 %v1552_v13  ;;  %1394 = vmatprep.subr.bf16.mxu0 %v1553_v14 }
  0x2e   :  { %1416 = vmatprep.subr.bf16.mxu1 %v1554_v15 }
  0x30   :  { %1395 = vmatpush3.bf16.msra.mxu0 %v1555_v16 }
  0x31   :  { %1417 = vmatpush3.bf16.msra.mxu1 %v1556_v17  ;;  %1396 = vmatprep.subr.bf16.mxu0 %v1557_v18 }
  0x32   :  { %1418 = vmatprep.subr.bf16.mxu1 %v1558_v19 }
  0x34   :  { %1397 = vmatpush3.bf16.msra.mxu0 %v1559_v20 }
  0x35   :  { %1419 = vmatpush3.bf16.msra.mxu1 %v1560_v21  ;;  %1398 = vmatprep.subr.bf16.mxu0 %v1561_v22 }
  0x36   :  { %1420 = vmatprep.subr.bf16.mxu1 %v1562_v23 }
  0x38   :  { %1399 = vmatpush3.bf16.msra.mxu0 %v1563_v24 }
  0x39   :  { %1421 = vmatpush3.bf16.msra.mxu1 %v1564_v25  ;;  %1400 = vmatprep.subr.bf16.mxu0 %v1565_v26 }
  0x3a   :  { %1422 = vmatprep.subr.bf16.mxu1 %v1566_v27 }
  0x3c   :  { %1401 = vmatpush3.bf16.msra.mxu0 %v1567_v28 }
  0x3d   :  { %1423 = vmatpush3.bf16.msra.mxu1 %v1568_v29  ;;  %1402 = vmatprep.subr.bf16.mxu0 %v1569_v30 }
  0x3e   :  { %1424 = vmatprep.subr.bf16.mxu1 %v1570_v31 }
  0x40   :  { %1403 = vmatpush3.bf16.msra.mxu0 %v1571_v32 }
  0x41   :  { %1425 = vmatpush3.bf16.msra.mxu1 %v1572_v33  ;;  %1450 = vmatprep.subr.bf16.mxu0 %v1642_v43 }
  0x42   :  { %1470 = vmatprep.subr.bf16.mxu1 %v1642_v43 }
  0x43   :  { %862 = vmatmul.mubr.bf16.vlgmr.msra.gmra.mrb[4].mxu0 %v224_v61 }
  0x44   :  { %903 = vmatmul.mubr.bf16.vlgmr.msra.gmra.mrb[4].mxu1 %v226_v63  ;;  %1451 = vmatpush3.bf16.msra.mxu0 %v1585_v0 }
  0x45   :  { %1452 = vmatprep.subr.bf16.mxu0 %v1642_v43  ;;  %1466 = vmatprep.mubr.msk.bf16.mxu0 %vm1643_vm0, %v1642_v43 }
  0x46   :  { %1486 = vmatprep.mubr.msk.bf16.mxu1 %vm1643_vm0, %v1642_v43  ;;  %1471 = vmatpush3.bf16.msra.mxu1 %v1593_v8 }
  0x47   :  { %1472 = vmatprep.subr.bf16.mxu1 %v1642_v43 }
  0x48   :  { %1453 = vmatpush3.bf16.msra.mxu0 %v1586_v1 }
  0x49   :  { %1454 = vmatprep.subr.bf16.mxu0 %v1642_v43 }
  0x4a   :  { %1473 = vmatpush3.bf16.msra.mxu1 %v1594_v9 }
  0x4b   :  { %1474 = vmatprep.subr.bf16.mxu1 %v1642_v43 }
  0x4c   :  { %1455 = vmatpush3.bf16.msra.mxu0 %v1587_v2 }
  0x4d   :  { %1456 = vmatprep.subr.bf16.mxu0 %v1642_v43 }
  0x4e   :  { %1475 = vmatpush3.bf16.msra.mxu1 %v1595_v54 }
  0x4f   :  { %1476 = vmatprep.subr.bf16.mxu1 %v1642_v43 }
  0x50   :  { %1457 = vmatpush3.bf16.msra.mxu0 %v1588_v3 }
  0x51   :  { %1458 = vmatprep.subr.bf16.mxu0 %v1642_v43 }
  0x52   :  { %1477 = vmatpush3.bf16.msra.mxu1 %v1596_v55 }
  0x53   :  { %1478 = vmatprep.subr.bf16.mxu1 %v1642_v43 }
  0x54   :  { %1459 = vmatpush3.bf16.msra.mxu0 %v1589_v4 }
  0x55   :  { %1460 = vmatprep.subr.bf16.mxu0 %v1642_v43 }
  0x56   :  { %1479 = vmatpush3.bf16.msra.mxu1 %v1597_v56 }
  0x57   :  { %1480 = vmatprep.subr.bf16.mxu1 %v1642_v43 }
  0x58   :  { %1461 = vmatpush3.bf16.msra.mxu0 %v1590_v5 }
  0x59   :  { %1462 = vmatprep.subr.bf16.mxu0 %v1642_v43 }
  0x5a   :  { %1481 = vmatpush3.bf16.msra.mxu1 %v1598_v57 }
  0x5b   :  { %1482 = vmatprep.subr.bf16.mxu1 %v1642_v43 }
  0x5c   :  { %1463 = vmatpush3.bf16.msra.mxu0 %v1591_v6 }
  0x5d   :  { %1464 = vmatprep.subr.bf16.mxu0 %v1642_v43 }
  0x5e   :  { %1483 = vmatpush3.bf16.msra.mxu1 %v1599_v58 }
  0x5f   :  { %1484 = vmatprep.subr.bf16.mxu1 %v1642_v43 }
  0x60   :  { %1465 = vmatpush3.bf16.msra.mxu0 %v1592_v7 }
  0x62   :  { %1485 = vmatpush3.bf16.msra.mxu1 %v1600_v59 }
  0xf6   :  { %v1360_v10 = vpop.f32.mrb[0].mxu0 }
  0xf7   :  { %v1382_v11 = vpop.f32.mrb[0].mxu1  ;;  %v1361_v13 = vpop.f32.mrb[1].mxu0 }
  0xf8   :  { %v1362_v14 = vadd.f32 %v1361_v13, %v1360_v10  ;;  %v1383_v15 = vpop.f32.mrb[1].mxu1  ;;  %v1363_v16 = vpop.f32.mrb[2].mxu0 }
  0xf9   :  { %v1384_v17 = vadd.f32 %v1383_v15, %v1382_v11  ;;  %v1385_v18 = vpop.f32.mrb[2].mxu1  ;;  %v1364_v19 = vpop.f32.mrb[3].mxu0  ;;  %v1330_v11 = vld [vmem:[%s2043_s6] ss:$0 sm:$0xff] }
  0xfa   :  { %v782_v20 = vadd.f32 %v1362_v14, %v1256_v12  ;;  %v1365_v21 = vadd.f32 %v1364_v19, %v1363_v16  ;;  %v1386_v22 = vpop.f32.mrb[3].mxu1 }
  0xfb   :  { %v1387_v23 = vadd.f32 %v1386_v22, %v1385_v18 }
  0xfc   :  { %v823_v24 = vadd.f32 %v1384_v17, %v782_v20  ;;  %v785_v25 = vadd.f32 %v1365_v21, %v1256_v12 }
  0xfe   :  { %v826_v26 = vadd.f32 %v1387_v23, %v785_v25 }
 0x116   :  { %v1404_v27 = vpop.f32.mrb[4].mxu0 }
 0x117   :  { %v1426_v28 = vpop.f32.mrb[4].mxu1  ;;  %v1405_v29 = vpop.f32.mrb[5].mxu0 }
 0x118   :  { %v1406_v30 = vadd.f32 %v1405_v29, %v1404_v27  ;;  %v1427_v31 = vpop.f32.mrb[5].mxu1  ;;  %v1407_v32 = vpop.f32.mrb[6].mxu0 }
 0x119   :  { %v1428_v33 = vadd.f32 %v1427_v31, %v1426_v28  ;;  %v1429_v34 = vpop.f32.mrb[6].mxu1  ;;  %v1408_v36 = vpop.f32.mrb[7].mxu0  ;;  %v1644_v28 = vmov 1966171168  }
 0x11a   :  { %v864_v37 = vadd.f32 %v1406_v30, %v823_v24  ;;  %v1409_v38 = vadd.f32 %v1408_v36, %v1407_v32  ;;  %v1430_v39 = vpop.f32.mrb[7].mxu1  ;;  %v1177_v29 = vunpack.c.l.s4 %v1644_v28 }
 0x11b   :  { %v1431_v40 = vadd.f32 %v1430_v39, %v1429_v34 }
 0x11c   :  { %v905_v41 = vadd.f32 %v1428_v33, %v864_v37  ;;  %v867_v42 = vadd.f32 %v1409_v38, %v826_v26  ;;  %v1178_v32 = vunpack.c.0.s8 %v1177_v29 }
 0x11e   :  { %v911_v44 = vmul.f32 0.5, %v905_v41  ;;  %v908_v45 = vadd.f32 %v1431_v40, %v867_v42  ;;  %v1181_v37 = vsub.s32 %v1178_v32, %v1784_v35 }
 0x120   :  { %1601 = vtanh.f32 %v911_v44  ;;  %v912_v46 = vmul.f32 0.5, %v908_v45 }
 0x122   :  { %1603 = vtanh.f32 %v912_v46 }
 0x12a   :  { %v1602_v47 = vpop.eup %1601 }
 0x12b   :  { %v915_v48 = vmul.f32 0.5, %v1602_v47 }
 0x12c   :  { %v1604_v49 = vpop.eup %1603 }
 0x12d   :  { %v916_v50 = vmul.f32 0.5, %v1604_v49  ;;  %v917_v51 = vadd.f32 0.5, %v915_v48 }
 0x12f   :  { %v918_v52 = vadd.f32 0.5, %v916_v50 }
 0x131   :  { %v919_v53 = vpack.c.bf16 %v918_v52, %v917_v51 }
 0x133   :  { %1467 = vmatmul.mubr.bf16.vlgmr.msra.gmra.mrb[8].mxu0 %v919_v53 }
 0x206   :  { %v1025_v61 = vpop.f32.mrb[8].mxu0 }
 0x207   :  { %v1026_v62 = vadd.f32 %v1321_v60, %v1025_v61  ;;  %v1468_v63 = vpop.f32.mrb[9].mxu0 }
 0x208   :  { %v1028_v0 = vpop.f32.mrb[10].mxu0 }
 0x209   :  { %v1032_v1 = vmul.f32 0.5, %v1026_v62  ;;  %v1029_v2 = vadd.f32 %v1321_v60, %v1028_v0  ;;  %v1469_v3 = vpop.f32.mrb[11].mxu0 }
 0x20b   :  { %1605 = vtanh.f32 %v1032_v1  ;;  %v1033_v4 = vmul.f32 0.5, %v1029_v2 }
 0x20d   :  { %1607 = vtanh.f32 %v1033_v4 }
 0x215   :  { %v1606_v43 = vpop.eup %1605 }
 0x216   :  { %v1036_v5 = vmul.f32 0.5, %v1606_v43 }
 0x217   :  { %v1608_v6 = vpop.eup %1607 }
 0x218   :  { %v1037_v7 = vmul.f32 0.5, %v1608_v6  ;;  %v1038_v8 = vadd.f32 0.5, %v1036_v5 }
 0x21a   :  { %v1039_v9 = vadd.f32 0.5, %v1037_v7 }
 0x21c   :  { %v1040_v10 = vpack.c.bf16 %v1039_v9, %v1038_v8 }
 0x21e   :  { %1487 = vmatmul.mubr.bf16.vlgmr.msra.gmra.mrb[8].mxu1 %v1040_v10 }
 0x2f1   :  { %v1146_v12 = vpop.f32.mrb[8].mxu1 }
 0x2f2   :  { %v1147_v13 = vadd.f32 %v1330_v11, %v1146_v12  ;;  %v1488_v14 = vpop.f32.mrb[9].mxu1 }
 0x2f3   :  { %v1149_v15 = vpop.f32.mrb[10].mxu1 }
 0x2f4   :  { %1153 = vmax.xlane.f32.xlu0 %v1147_v13  ;;  %v1489_v16 = vpop.f32.mrb[11].mxu1  ;;  %v1150_v17 = vadd.f32 %v1330_v11, %v1149_v15 }
 0x2f8   :  { %1155 = vmax.xlane.f32.xlu0 %v1150_v17 }
 0x381   :  { %v1154_v18 = vpop.xlane.xlu0 %1153 }
 0x382   :  { %v1157_v19 = vsub.f32 %v1147_v13, %v1154_v18 }
 0x384   :  { %v1159_v20 = vmul.f32 1.442695, %v1157_v19 }
 0x385   :  { %v1156_v21 = vpop.xlane.xlu0 %1155 }
 0x386   :  { %v1158_v22 = vsub.f32 %v1150_v17, %v1156_v21  ;;  %1609 = vpow2.f32 %v1159_v20 }
 0x388   :  { %v1161_v23 = vmul.f32 1.442695, %v1158_v22 }
 0x38a   :  { %1611 = vpow2.f32 %v1161_v23 }
 0x390   :  { %v1610_v24 = vpop.eup %1609 }
 0x391   :  { %1163 = vadd.xlane.f32.xlu1 %v1610_v24 }
 0x394   :  { %v1612_v25 = vpop.eup %1611 }
 0x395   :  { %1165 = vadd.xlane.f32.xlu1 %v1612_v25 }
 0x41e   :  { %v1164_v26 = vpop.xlane.xlu1 %1163 }
 0x41f   :  { %1613 = vlog2.f32 %v1164_v26 }
 0x422   :  { %v1166_v27 = vpop.xlane.xlu1 %1165 }
 0x423   :  { %1615 = vlog2.f32 %v1166_v27 }
 0x429   :  { %v1614_v30 = vpop.eup %1613 }
 0x42a   :  { %v1168_v31 = vmul.f32 0.6931472, %v1614_v30 }
 0x42c   :  { %v1171_v36 = vsub.f32 %v1157_v19, %v1168_v31 }
 0x42d   :  { %v1616_v33 = vpop.eup %1615 }
 0x42e   :  { %v1170_v34 = vmul.f32 0.6931472, %v1616_v33 }
 0x430   :  { %v1172_v38 = vsub.f32 %v1158_v22, %v1170_v34 }
 0x432   :  { %v1173_v39 = vpack.c.bf16 %v1172_v38, %v1171_v36  ;;  %v1339_v40 = vpack.c.bf16 %v1172_v38, %v1172_v38 }
 0x434   :  { %v1182_v41 = vrot.slane %v1173_v39, %v1181_v37  ;;  %v1189_v42 = vrot.slane %v1339_v40, %v1181_v37 }
 0x436   :  { %v1190_v44 = vcombine.high %v1182_v41, %v1182_v41  ;;  %v1191_v45 = vcombine.high %v1189_v42, %v1189_v42  ;;  %v1198_v46 = vrot.slane %v1182_v41, %v1181_v37  ;;  %v1205_v47 = vrot.slane %v1189_v42, %v1181_v37  ;;  %1340 = vst.sshfl [vmem:[#allocation2] sm:$0x1 pattern:$0x73625140] %v1182_v41 }
 0x437   :  { %1342 = vst.sshfl [vmem:[#allocation2 + $0x4] sm:$0x1 pattern:$0x73625140] %v1189_v42 }
 0x438   :  { %v1212_v48 = vrot.slane %v1190_v44, %v1181_v37  ;;  %v1219_v49 = vrot.slane %v1191_v45, %v1181_v37  ;;  %v1220_v50 = vcombine.high %v1198_v46, %v1198_v46  ;;  %v1221_v51 = vcombine.high %v1205_v47, %v1205_v47  ;;  %1341 = vst.sshfl [vmem:[#allocation2 + $0x1] sm:$0x1 pattern:$0x73625140] %v1190_v44 }
 0x439   :  { %1343 = vst.sshfl [vmem:[#allocation2 + $0x5] sm:$0x1 pattern:$0x73625140] %v1191_v45 }
 0x43a   :  { %v1222_v52 = vcombine.high %v1212_v48, %v1212_v48  ;;  %v1223_v53 = vcombine.high %v1219_v49, %v1219_v49  ;;  %1234 = vst [vmem:[#allocation2 + $0x2] sm:$0x1] %v1220_v50  ;;  %1238 = vst [vmem:[#allocation2 + $0x6] sm:$0x1] %v1221_v51 }
 0x43c   :  { %1235 = vst [vmem:[#allocation2 + $0x3] sm:$0x1] %v1222_v52  ;;  %1239 = vst [vmem:[#allocation2 + $0x7] sm:$0x1] %v1223_v53 }
 0x43d   :  { %1244 = vsyncadd [#allocation3], 112  ;;  %s1645_s6 = smov [#allocation2]  }
 0x43e   :  { %s1245_s30 = sshll.u32 %s1645_s6, 4  ;;  %s1246_s30 = int_to_ptr.vmem [resolvable:$true] %s1245_s30 }
 0x43f   :  { %s1617_s8 = scalar_lea.vmem %s1246_s30, 16  ;;  %s1621_s9 = scalar_lea.vmem %s1246_s30, 128 }
 0x440   :  { %p1618_p0 = scmp.ne.s32.totalorder %s1246_s30, %s1617_s8  ;;  %p1622_p1 = scmp.lt.s32.totalorder %s1246_s30, %s1246_s30 }
 0x441   :  { %p1623_p2 = scmp.lt.s32.totalorder %s1621_s9, %s1617_s8 }
 0x443   :  { %p1624_p3 = por %p1623_p2, %p1622_p1 }
 0x445   :  { %p1625_p4 = pnand %p1624_p3, %p1618_p0 }
 0x447   :  { %1628 = shalt.err (!%p1625_p4)
}
 0x448   :  { %s1629_s12 = scalar_lea.hbm %s2044_s7, 16 }
 0x449   :  { %p1630_p5 = scmp.ne.s32.totalorder %s2044_s7, %s1629_s12  ;;  %p1633_p6 = scmp.lt.u32.totalorder %s1629_s12, %s2044_s7 }
 0x44b   :  { %p1635_p7 = pnand %p1633_p6, %p1630_p5 }
 0x44d   :  { %1638 = shalt.err (!%p1635_p7)
}
 0x44e   :  { %s1646_s16 = smov 16   ;;  %s1647_s3 = smov 1  }
 0x44f   :  { %1251 = dma.vmem_to_hbm [thread:$0]  %s1246_s30, 16, %s2044_s7, [#allocation3], %s1646_s16, %s1646_s16, %s1647_s3  }
 0x450   :  { %1639 = dma.done.wait [#allocation3], 128  }
 0x451   :  { %1640 = vsyncadd [#allocation3], 4294967168 }
 0x452   :  { %1255 = vsyncpa [#allocation3], 1 }

</bundles_post_ra>
